<compile_context>
chip_gen: v7x
topology: tpu7x:2x2x1
jax: 0.10.0
libtpu: 0.0.40
codegen_flags: <defaults>
</compile_context>

<pallas_src>
import functools

import jax
import jax.numpy as jnp
from jax import lax
from jax.experimental import pallas as pl
from jax.experimental.pallas import tpu as pltpu

_MIB = 1024 * 1024


def _tpu_vmem_capacity_bytes(default=64 * _MIB):
    """Physical VMEM per core; conservative (v7x-sized) default if unavailable."""
    try:
        return int(pltpu.get_tpu_info().vmem_capacity_bytes)
    except Exception:
        return default


def _pow_p(x, p):
    """x ** p.  Integer 1 <= p <= 8 uses a VPU multiply ladder (keeps the big
    tensor off the single-slot EUP).  Non-integer p falls back to generic pow,
    which makes the kernel EUP-bound -- callers should keep p integral."""
    p_int = int(round(float(p)))
    if abs(float(p) - p_int) < 1e-12 and 1 <= p_int <= 8:
        xp = x
        for _ in range(p_int - 1):
            xp = xp * x
        return xp
    return x ** jnp.float32(p)


# ---------------------------------------------------------------------------
# Kernels
# ---------------------------------------------------------------------------
def _gem_fused_kernel(x_ref, o_ref, *, p, eps, inv_hw):
    """Fast path: x_ref (tile_r, HW) -> o_ref (tile_r, 1), fully fused."""
    x = x_ref[...].astype(jnp.float32)
    x = jnp.maximum(x, eps)                         # clamp(min=eps) BEFORE pow (torch)
    xp = _pow_p(x, p)
    m = jnp.sum(xp, axis=-1, keepdims=True) * inv_hw
    o_ref[...] = (m ** (1.0 / p)).astype(o_ref.dtype)


def _gem_split_hw_kernel(x_ref, o_ref, acc_ref, *, p, eps, inv_hw, hw, tile_hw,
                         need_mask):
    """Huge-HW path: x_ref (tile_r, tile_hw), f32 accumulator over the HW axis."""
    j = pl.program_id(1)

    @pl.when(j == 0)
    def _init():
        acc_ref[...] = jnp.zeros_like(acc_ref)

    x = x_ref[...].astype(jnp.float32)
    x = jnp.maximum(x, eps)
    xp = _pow_p(x, p)
    if need_mask:
        # Zero out columns past the true H*W extent (ragged last HW tile).
        col = lax.broadcasted_iota(jnp.int32, xp.shape, 1) + j * tile_hw
        xp = jnp.where(col < hw, xp, 0.0)
    acc_ref[...] += jnp.sum(xp, axis=-1, keepdims=True)

    @pl.when(j == pl.num_programs(1) - 1)
    def _finalize():
        m = acc_ref[...] * inv_hw
        o_ref[...] = (m ** (1.0 / p)).astype(o_ref.dtype)


# ---------------------------------------------------------------------------
# Tile selection
# ---------------------------------------------------------------------------
def _round_down_mult(x, m):
    return (x // m) * m


def _pick_row_tile(rows, hw, itemsize, alloc_budget, in_block_cap):
    """Rows per block for the fused (full-HW) path."""
    # Per-row VMEM cost: double-buffered input row + double-buffered, lane-padded
    # (tile_r, 1) output row (a last-dim-1 block pads to 128 lanes in VMEM).
    per_row = 2 * hw * itemsize + 2 * 128 * itemsize
    t = max(8, alloc_budget // per_row)
    t = min(t, max(8, in_block_cap // max(1, hw * itemsize)))
    # Keep >= 2 (ideally >= 4) grid steps so both v7x TensorCores get work and
    # the input DMA pipelines across steps (also helps single-core chips).
    if rows >= 32:
        t = min(t, pl.cdiv(rows, 4))
    elif rows >= 16:
        t = min(t, pl.cdiv(rows, 2))
    if t >= rows:
        return rows                     # single full block (any row count is legal)
    return max(8, _round_down_mult(t, 8))


# ---------------------------------------------------------------------------
# Wrapper
# ---------------------------------------------------------------------------
def gem_pool(x_nchw, p=3, eps=1e-6, *, _force_hw_tile=None):
    """GeM pooling.  x_nchw: (N, C, H, W)  ->  (N, C)."""
    N, C, H, W = x_nchw.shape
    HW = H * W
    R = N * C
    itemsize = jnp.dtype(x_nchw.dtype).itemsize
    x2d = x_nchw.reshape(R, HW)         # free view of NCHW: rows = contiguous HW runs

    # Per-generation budgets (v7x has only 64 MiB physical VMEM / 32 MiB scoped).
    phys_vmem = _tpu_vmem_capacity_bytes()
    if phys_vmem <= 96 * _MIB:          # v7x-class
        in_block_cap, alloc_budget, limit_cap = 12 * _MIB, 24 * _MIB, 32 * _MIB
    else:                               # v5e / v6e (128 MiB VMEM)
        in_block_cap, alloc_budget, limit_cap = 16 * _MIB, 40 * _MIB, 56 * _MIB

    cost = pl.CostEstimate(
        flops=int(4 * R * HW),
        transcendentals=int(2 * R),
        bytes_accessed=int(R * HW * itemsize + R * itemsize),
    )
    use_split_hw = (_force_hw_tile is not None) or (8 * HW * itemsize > in_block_cap)

    if not use_split_hw:
        # -------- Fast path: whole H*W per block, 1-D parallel grid over rows.
        tile_r = _pick_row_tile(R, HW, itemsize, alloc_budget, in_block_cap)
        grid = (pl.cdiv(R, tile_r),)
        vmem_limit = 2 * tile_r * HW * itemsize + 2 * tile_r * 128 * itemsize + 4 * _MIB
        vmem_limit = int(min(limit_cap, max(16 * _MIB, vmem_limit)))

        kernel = functools.partial(_gem_fused_kernel, p=float(p), eps=float(eps),
                                   inv_hw=1.0 / float(HW))
        out = pl.pallas_call(
            kernel,
            out_shape=jax.ShapeDtypeStruct((R, 1), x_nchw.dtype),
            grid_spec=pltpu.PrefetchScalarGridSpec(
                num_scalar_prefetch=0,
                grid=grid,
                in_specs=[pl.BlockSpec((tile_r, HW), lambda r: (r, 0))],
                out_specs=pl.BlockSpec((tile_r, 1), lambda r: (r, 0)),
            ),
            compiler_params=pltpu.CompilerParams(
                dimension_semantics=("parallel",),
                vmem_limit_bytes=vmem_limit,
            ),
            cost_estimate=cost,
        )(x2d)
        return out.reshape(N, C)

    # -------- Split-HW path: spatial map too large for a full-row block.
    tile_r = R if R < 8 else 8
    if _force_hw_tile is not None:
        tile_hw = int(_force_hw_tile)
    else:
        tile_hw = _round_down_mult(alloc_budget // (2 * tile_r * itemsize), 128)
    tile_hw = max(128, min(tile_hw, max(128, _round_down_mult(HW, 128))))
    need_mask = (HW % tile_hw) != 0
    grid = (pl.cdiv(R, tile_r), pl.cdiv(HW, tile_hw))

    vmem_limit = (2 * tile_r * tile_hw * itemsize            # input double buffer
                  + 2 * tile_r * 128 * itemsize              # padded output buffers
                  + tile_r * 128 * 4                         # padded f32 accumulator
                  + 4 * _MIB)
    vmem_limit = int(min(limit_cap, max(16 * _MIB, vmem_limit)))

    kernel = functools.partial(_gem_split_hw_kernel, p=float(p), eps=float(eps),
                               inv_hw=1.0 / float(HW), hw=HW, tile_hw=tile_hw,
                               need_mask=need_mask)
    out = pl.pallas_call(
        kernel,
        out_shape=jax.ShapeDtypeStruct((R, 1), x_nchw.dtype),
        grid_spec=pltpu.PrefetchScalarGridSpec(
            num_scalar_prefetch=0,
            grid=grid,
            in_specs=[pl.BlockSpec((tile_r, tile_hw), lambda r, j: (r, j))],
            out_specs=pl.BlockSpec((tile_r, 1), lambda r, j: (r, 0)),
            scratch_shapes=[pltpu.VMEM((tile_r, 1), jnp.float32)],
        ),
        compiler_params=pltpu.CompilerParams(
            dimension_semantics=("parallel", "arbitrary"),
            vmem_limit_bytes=vmem_limit,
        ),
        cost_estimate=cost,
    )(x2d)
    return out.reshape(N, C)


def gem_ref(x_nchw, p=3, eps=1e-6):
    """Pure-JAX reference matching the PyTorch semantics."""
    xc = jnp.maximum(x_nchw.astype(jnp.float32), eps)
    pooled = jnp.mean(xc ** p, axis=(-2, -1)) ** (1.0 / p)     # (N, C)
    return pooled.astype(x_nchw.dtype)


if __name__ == "__main__":
    # Module __init__: p=3, eps=1e-6, p_trainable=False -> p is a plain scalar,
    # so there are no trainable parameters to initialize.
    p, eps = 3, 1e-6
    key = jax.random.PRNGKey(0)
    k1, k2, k3 = jax.random.split(key, 3)

    # 1) Required small shape (fast path, single block).
    x1 = jax.random.normal(k1, (2, 4, 16, 16), dtype=jnp.float32)
    o1 = jax.block_until_ready(gem_pool(x1, p, eps))
    r1 = gem_ref(x1, p, eps)
    assert o1.shape == (2, 4), o1.shape
    assert jnp.allclose(o1, r1, rtol=1e-4, atol=1e-5), float(jnp.max(jnp.abs(o1 - r1)))

    # 2) Backbone-like shape (channel-heavy, tiny spatial map): exercises the
    #    flattened multi-block fast path (>= 4 parallel row tiles).
    x2 = jax.random.normal(k2, (2, 256, 7, 7), dtype=jnp.float32)
    o2 = jax.block_until_ready(gem_pool(x2, p, eps))
    r2 = gem_ref(x2, p, eps)
    assert o2.shape == (2, 256), o2.shape
    assert jnp.allclose(o2, r2, rtol=1e-4, atol=1e-5), float(jnp.max(jnp.abs(o2 - r2)))

    # 3) Split-HW accumulator path, forced small so it runs at test size,
    #    including the ragged-HW lane mask (25*40 = 1000 not a multiple of 256).
    x3 = jax.random.normal(k3, (2, 8, 25, 40), dtype=jnp.float32)
    o3 = jax.block_until_ready(gem_pool(x3, p, eps, _force_hw_tile=256))
    r3 = gem_ref(x3, p, eps)
    assert o3.shape == (2, 8), o3.shape
    assert jnp.allclose(o3, r3, rtol=1e-4, atol=1e-5), float(jnp.max(jnp.abs(o3 - r3)))

    print("KERNEL_OK")
</pallas_src>

<mosaic_0001>
module attributes {stable_mosaic.version = 11 : i64} {
  func.func @_gem_fused_kernel(%arg0: i32, %arg1: memref<8x256xf32, #tpu.memory_space<vmem>>, %arg2: memref<8x1xf32, #tpu.memory_space<vmem>>) attributes {dimension_semantics = [#tpu.dimension_semantics<parallel>], iteration_bounds = array<i64: 1>, scalar_prefetch = 0 : i64, scratch_operands = 0 : i64, tpu.core_type = #tpu.core_type<tc>, window_params = [{transform_indices = @transform_0, window_bounds = array<i64: 8, 256>}, {transform_indices = @transform_1, window_bounds = array<i64: 8, 1>}]} {
    %c0 = arith.constant 0 : index
    %c0_0 = arith.constant 0 : index
    %0 = vector.load %arg1[%c0, %c0_0] : memref<8x256xf32, #tpu.memory_space<vmem>>, vector<8x256xf32>
    %cst = arith.constant 9.99999997E-7 : f32
    %1 = vector.broadcast %cst : f32 to vector<8x256xf32>
    %2 = arith.maximumf %0, %1 : vector<8x256xf32>
    %3 = arith.mulf %2, %2 : vector<8x256xf32>
    %4 = arith.mulf %3, %2 : vector<8x256xf32>
    %cst_1 = arith.constant dense<0.000000e+00> : vector<8xf32>
    %5 = vector.multi_reduction <add>, %4, %cst_1 [1] : vector<8x256xf32> to vector<8xf32>
    %6 = vector.shape_cast %5 : vector<8xf32> to vector<8x1xf32>
    %cst_2 = arith.constant 3.906250e-03 : f32
    %7 = vector.broadcast %cst_2 : f32 to vector<8x1xf32>
    %8 = arith.mulf %6, %7 : vector<8x1xf32>
    %cst_3 = arith.constant 0.333333343 : f32
    %9 = vector.broadcast %cst_3 : f32 to vector<8x1xf32>
    %10 = math.powf %8, %9 : vector<8x1xf32>
    %c0_4 = arith.constant 0 : index
    %c0_5 = arith.constant 0 : index
    %11 = vector.load %arg2[%c0_4, %c0_5] : memref<8x1xf32, #tpu.memory_space<vmem>>, vector<8x1xf32>
    tpu.vector_store %arg2[%c0_4, %c0_5], %10 {strides = array<i32>} : memref<8x1xf32, #tpu.memory_space<vmem>>, vector<8x1xf32>,
    return
  }
  func.func @transform_0(%arg0: i32) -> (i32, i32) {
    %c0_i32 = arith.constant 0 : i32
    %c0_i32_0 = arith.constant 0 : i32
    return %arg0, %c0_i32 : i32, i32
  }
  func.func @transform_1(%arg0: i32) -> (i32, i32) {
    %c0_i32 = arith.constant 0 : i32
    %c0_i32_0 = arith.constant 0 : i32
    return %arg0, %c0_i32 : i32, i32
  }
}

</mosaic_0001>

<bundles_post_ra>
// kernel: tpu_custom_call.1
= control target key start
LH: loop header
LB: loop body
LE: loop exit
PB: predicated region body
PF: predicated region fallthrough
CT: control target
= control target key end

     0   :  { %6 = vsyncpa [#allocation3], 0  ;;  %s87_s6 = smov [#allocation2]   ;;  %s113_s0 = inlined_call_operand.hbm [shape: f32[8,256], index: 0, kind: input, shape index: {}]   ;;  %s114_s1 = inlined_call_operand.vmem [shape: f32[8,1], index: 1, kind: output, shape index: {}]  }
   0x1   :  { %s13_s7 = sshll.u32 %s87_s6, 4  ;;  %s63_s10 = scalar_lea.hbm %s113_s0, 256  ;;  %s14_s7 = int_to_ptr.vmem [resolvable:$true] %s13_s7 }
   0x2   :  { %p64_p0 = scmp.ne.s32.totalorder %s113_s0, %s63_s10  ;;  %p67_p1 = scmp.lt.u32.totalorder %s63_s10, %s113_s0 }
   0x4   :  { %p69_p2 = pnand %p67_p1, %p64_p0 }
   0x6   :  { %72 = shalt.err (!%p69_p2)
}
   0x7   :  { %s73_s15 = scalar_lea.vmem %s14_s7, 256  ;;  %p78_p4 = scmp.lt.s32.totalorder %s14_s7, %s14_s7 }
   0x8   :  { %p74_p3 = scmp.ne.s32.totalorder %s14_s7, %s73_s15  ;;  %p79_p5 = scmp.lt.s32.totalorder %s73_s15, %s73_s15 }
   0xa   :  { %p80_p6 = por %p79_p5, %p78_p4 }
   0xc   :  { %p81_p7 = pnand %p80_p6, %p74_p3 }
   0xe   :  { %84 = shalt.err (!%p81_p7)
}
   0xf   :  { %16 = dma.hbm_to_vmem [thread:$0]  %s113_s0, 256, %s14_s7, [#allocation3]  }
  0x10   :  { %85 = dma.done.wait [#allocation3], 256  }
  0x11   :  { %86 = vsyncadd [#allocation3], 4294967040  ;;  %v20_v0 = vld [vmem:[#allocation2] sm:$0xff]  ;;  %v21_v1 = vld [vmem:[#allocation2 + $0x8] sm:$0xff]  ;;  %vm33_vm4 = vcmask 7168  }
  0x12   :  { %v22_v2 = vmax.f32 %v20_v0, 1e-06  ;;  %v23_v3 = vmax.f32 %v21_v1, 1e-06 }
  0x14   :  { %v24_v4 = vmul.f32 %v22_v2, %v22_v2  ;;  %v25_v5 = vmul.f32 %v23_v3, %v23_v3 }
  0x16   :  { %v26_v6 = vmul.f32 %v24_v4, %v22_v2  ;;  %v27_v7 = vmul.f32 %v25_v5, %v23_v3 }
  0x18   :  { %v28_v8 = vadd.f32 %v27_v7, %v26_v6 }
  0x1a   :  { %29 = vadd.xlane.f32.xlu0 %v28_v8 }
  0xa7   :  { %v30_v9 = vpop.xlane.xlu0 %29 }
  0xa8   :  { %v31_v10 = vmul.f32 0.00390625, %v30_v9 }
  0xaa   :  { %v42_v11 = vand.u32 2147483647, %v31_v10  ;;  %v46_v14 = vand.u32 2147483648, %v31_v10  ;;  %vm41_vm2 = vcmp.lt.f32.partialorder %v31_v10, 0.0  ;;  %vm40_vm3 = vcmp.eq.f32.partialorder %v31_v10, 0.0 }
  0xac   :  { %59 = vlog2.f32 %v42_v11  ;;  %vm50_vm0 = vweird.f32 %v42_v11  ;;  %vm52_vm1 = vcmp.eq.f32.partialorder %v42_v11, 0.0  ;;  %vm43_vm5 = vcmp.eq.f32.partialorder %v42_v11, inf }
  0xb6   :  { %v60_v12 = vpop.eup %59 }
  0xb7   :  { %v47_v13 = vmul.f32 0.33333334, %v60_v12 }
  0xb9   :  { %61 = vpow2.f32 %v47_v13 }
  0xc3   :  { %v62_v15 = vpop.eup %61 }
  0xc4   :  { %v49_v16 = vor.u32 %v62_v15, %v46_v14 }
  0xc6   :  { %v51_v17 = vsel %vm50_vm0, %v31_v10, %v49_v16 }
  0xc7   :  { %v54_v18 = vsel %vm52_vm1, %v46_v14, %v51_v17 }
  0xc8   :  { %v55_v19 = vsel %vm41_vm2, nan, %v54_v18 }
  0xc9   :  { %v56_v20 = vsel %vm40_vm3, 0.0, %v55_v19 }
  0xca   :  { %v57_v21 = vsel %vm43_vm5, inf, %v56_v20 }
  0xcb   :  { %34 = vst.msk [vmem:[%s114_s1] sm:$0xff] %vm33_vm4, %v57_v21 }
  0xcc   :  { %39 = vsyncpa [#allocation3], 1 }

</bundles_post_ra>
